<compile_context>
chip_gen: v6e
topology: v6e:2x2x1
jax: 0.10.0
libtpu: 0.0.40
codegen_flags: <defaults>
</compile_context>

<pallas_src>
import math
import functools

import jax
import jax.numpy as jnp
from jax.experimental import pallas as pl
from jax.experimental.pallas import tpu as pltpu


# ---------------------------------------------------------------------------
# Per-generation configuration (v5e/v6e: 128 MiB VMEM/core, v7x: 64 MiB/core)
# ---------------------------------------------------------------------------
def _per_core_vmem_bytes():
    try:
        kind = jax.devices()[0].device_kind.lower()
    except Exception:
        kind = ""
    if "v5" in kind or "v6" in kind:
        return 128 * 1024 * 1024
    if "v7" in kind or "7x" in kind:
        return 64 * 1024 * 1024
    try:
        cap = getattr(pltpu.get_tpu_info(), "vmem_capacity_bytes", None)
        if cap:
            return int(cap)
    except Exception:
        pass
    return 64 * 1024 * 1024          # conservative fallback


_VMEM_CAP = _per_core_vmem_bytes()
_BIG_VMEM = _VMEM_CAP >= 96 * 1024 * 1024
_VMEM_LIMIT = (100 if _BIG_VMEM else 48) * 1024 * 1024
_LIN_TILE = 512 if _BIG_VMEM else 256     # tm / tn for the projection matmuls
_Q_BLOCK = 256 if _BIG_VMEM else 128      # query-dim tile of the attention kernel


# ---------------------------------------------------------------------------
# Tiling helper
# ---------------------------------------------------------------------------
def _tile(dim, target, granule):
    """Largest block size <= target that is a multiple of `granule` and divides
    `dim`; falls back to the full dim (a full-extent block is always legal)."""
    if dim <= target:
        return dim
    t = (target // granule) * granule
    while t >= granule:
        if dim % t == 0:
            return t
        t -= granule
    return dim


# ---------------------------------------------------------------------------
# Tiled linear projection:  y = x @ w_pt.T + b   (PyTorch nn.Linear semantics)
# ---------------------------------------------------------------------------
def _linear_kernel(x_ref, w_ref, b_ref, o_ref, acc_ref):
    @pl.when(pl.program_id(2) == 0)
    def _init():
        acc_ref[...] = jnp.zeros_like(acc_ref)

    # bf16 operands on the MXU, f32 accumulation; contract the minor (tk) dims
    # of both tiles so the PyTorch (out, in) weight needs no transpose copy.
    acc_ref[...] += jax.lax.dot_general(
        x_ref[...].astype(jnp.bfloat16),
        w_ref[...],                                   # (tn, tk) bf16
        (((1,), (1,)), ((), ())),
        preferred_element_type=jnp.float32)

    @pl.when(pl.program_id(2) == pl.num_programs(2) - 1)
    def _finalize():
        o_ref[...] = (acc_ref[...] + b_ref[...]).astype(o_ref.dtype)


def pallas_linear(x2d, w_pt, b, *, out_dtype=jnp.float32, tm=None, tn=None, tk=None):
    """y = x2d @ w_pt.T + b, tiled on the MXU.  w_pt stays in its native
    (out_features, in_features) layout; matmul operands are bf16, the
    accumulator and bias add are f32, the result is stored as `out_dtype`."""
    n, d_in = x2d.shape
    d_out = w_pt.shape[0]
    tm = _tile(n, tm or _LIN_TILE, 8)
    tn = _tile(d_out, tn or _LIN_TILE, 128)
    tk = _tile(d_in, tk or 512, 128)

    w_bf16 = w_pt.astype(jnp.bfloat16)                       # (d_out, d_in)
    bias = b.reshape(1, d_out).astype(jnp.float32)

    grid = (n // tm, d_out // tn, d_in // tk)
    flops = 2 * n * d_out * d_in
    bytes_accessed = (x2d.size * x2d.dtype.itemsize + w_bf16.size * 2
                      + bias.size * 4 + n * d_out * jnp.dtype(out_dtype).itemsize)

    return pl.pallas_call(
        _linear_kernel,
        out_shape=jax.ShapeDtypeStruct((n, d_out), out_dtype),
        grid_spec=pltpu.PrefetchScalarGridSpec(
            num_scalar_prefetch=0,
            grid=grid,
            in_specs=[
                pl.BlockSpec((tm, tk), lambda i, j, k: (i, k)),
                pl.BlockSpec((tn, tk), lambda i, j, k: (j, k)),   # (out, in) layout
                pl.BlockSpec((1, tn), lambda i, j, k: (0, j)),
            ],
            out_specs=pl.BlockSpec((tm, tn), lambda i, j, k: (i, j)),
            scratch_shapes=[pltpu.VMEM((tm, tn), jnp.float32)],
        ),
        compiler_params=pltpu.CompilerParams(
            dimension_semantics=("parallel", "parallel", "arbitrary"),
            vmem_limit_bytes=_VMEM_LIMIT),
        cost_estimate=pl.CostEstimate(flops=flops, transcendentals=0,
                                      bytes_accessed=int(bytes_accessed)),
    )(x2d, w_bf16, bias)


# ---------------------------------------------------------------------------
# RoPE + GQA attention kernel.
# One grid step = (batch b, kv-head g, query block qi): all `group` query heads
# sharing KV head g are processed in ONE flattened (group*Tq)-row matmul, so
# K/V are fetched once per group and the MXU M-dim is well filled.
# ---------------------------------------------------------------------------
def _rope_gqa_attn_kernel(q_ref, k_ref, v_ref, cosq_ref, sinq_ref,
                          cosk_ref, sink_ref, *refs, group, return_weights):
    # q_ref : (1, group, Tq, d_k) bf16   queries for this KV group
    # k_ref : (1, 1, S, d_k)      bf16   shared KV head
    # v_ref : (1, 1, S, d_k)      bf16
    # cosq_ref/sinq_ref : (Tq, d_k) f32  q-side RoPE tables, pre-scaled by 1/sqrt(d_k)
    # cosk_ref/sink_ref : (S, d_k)  f32  k-side tables (sin is sign-folded)
    # outputs: o_ref (1, group, Tq, d_k) bf16 [, w_ref (1, group, Tq, S) f32]
    # scratch: krot_ref (S, d_k) bf16 — rotated K, cached across the qi axis
    if return_weights:
        o_ref, w_ref, krot_ref = refs
    else:
        (o_ref, krot_ref), w_ref = refs, None

    S = k_ref.shape[2]
    d_k = k_ref.shape[3]
    Tq = q_ref.shape[2]
    half = d_k // 2

    # --- K-side RoPE: only once per (batch, kv-head); reused across q blocks ---
    @pl.when(pl.program_id(2) == 0)
    def _rotate_k():
        k = k_ref[0, 0].astype(jnp.float32)                       # (S, d_k)
        krot_ref[...] = (k * cosk_ref[...]
                         + pltpu.roll(k, shift=half, axis=1) * sink_ref[...]
                         ).astype(jnp.bfloat16)

    # --- Q-side RoPE over the whole head group, flattened for one matmul ---
    q = q_ref[0].astype(jnp.float32).reshape(group * Tq, d_k)     # (group*Tq, d_k)
    cos_q = jnp.tile(cosq_ref[...], (group, 1))
    sin_q = jnp.tile(sinq_ref[...], (group, 1))
    q_rot = (q * cos_q + pltpu.roll(q, shift=half, axis=1) * sin_q
             ).astype(jnp.bfloat16)

    dn = (((1,), (1,)), ((), ()))        # contract the minor d_k dims; no .T
    scores = jax.lax.dot_general(q_rot, krot_ref[...], dn,
                                 preferred_element_type=jnp.float32)  # (group*Tq, S)

    # TODO(synk): optional attention mask (mask == 0 -> -1e9) not wired; the
    # module's default mask=None path is reproduced here.
    m = jnp.max(scores, axis=-1, keepdims=True)
    p = jnp.exp(scores - m)
    denom = jnp.sum(p, axis=-1, keepdims=True)
    v = v_ref[0, 0]                                               # (S, d_k) bf16

    if return_weights:
        attn = p * pl.reciprocal(denom, approx=True)
        # store the weights before the PV matmul so the (group*Tq, S) writeback
        # streams out underneath the final MXU work
        w_ref[0] = attn.reshape(group, Tq, S)
        o = jnp.dot(attn.astype(jnp.bfloat16), v,
                    preferred_element_type=jnp.float32)
    else:
        # fast path: normalize after the PV matmul (O(Tq*d_k) instead of O(Tq*S))
        o = jnp.dot(p.astype(jnp.bfloat16), v,
                    preferred_element_type=jnp.float32)
        o = o * pl.reciprocal(denom, approx=True)

    o_ref[0] = o.reshape(group, Tq, d_k).astype(o_ref.dtype)


# ---------------------------------------------------------------------------
# Module wrapper (glue in plain JAX, hot path in Pallas)
# ---------------------------------------------------------------------------
def rope_gqa_forward(params, query, key, value, *, num_heads, num_kv_heads,
                     rope_base=10000.0, q_block=None, return_weights=True):
    """Returns (output [B,S,d_model] f32, attention_weights [B,H,S,S] f32 or None).

    Dropout is treated as eval-mode identity. The returned attention weights
    use the EUP approximate reciprocal and bf16 MXU scores, so they match exact
    f32 softmax only to a few 1e-3.
    """
    B, S, d_model = query.shape
    assert d_model % num_heads == 0 and num_heads % num_kv_heads == 0
    d_k = d_model // num_heads
    assert d_k % 2 == 0, "RoPE rotate-half needs an even head dim"
    group = num_heads // num_kv_heads
    scale = 1.0 / math.sqrt(d_k)

    # --- projections (tiled bf16 MXU matmuls, bf16 activations out) ---
    q = pallas_linear(query.reshape(B * S, d_model), params["wq"], params["bq"],
                      out_dtype=jnp.bfloat16)
    k = pallas_linear(key.reshape(B * S, d_model), params["wk"], params["bk"],
                      out_dtype=jnp.bfloat16)
    v = pallas_linear(value.reshape(B * S, d_model), params["wv"], params["bv"],
                      out_dtype=jnp.bfloat16)

    Q = q.reshape(B, S, num_heads, d_k).transpose(0, 2, 1, 3)       # (B, H, S, d_k)
    K = k.reshape(B, S, num_kv_heads, d_k).transpose(0, 2, 1, 3)    # (B, Hkv, S, d_k)
    V = v.reshape(B, S, num_kv_heads, d_k).transpose(0, 2, 1, 3)
    # TODO(synk): folding these head split/merge transposes into the kernels'
    # BlockSpecs needs (group*d_k) % 128 == 0 (the (8,128) block rule for column
    # slices of the packed projection layout); kept in XLA so arbitrary head
    # configs work — they now move bf16, i.e. half the bytes of the f32 version.

    # --- RoPE tables (rotate-half / LLaMA convention), f32 ---
    half = d_k // 2
    pos = jnp.arange(S, dtype=jnp.float32)
    inv_freq = 1.0 / (rope_base ** (jnp.arange(0, d_k, 2, dtype=jnp.float32) / d_k))
    ang = pos[:, None] * inv_freq[None, :]                               # (S, d_k/2)
    cos = jnp.concatenate([jnp.cos(ang), jnp.cos(ang)], axis=-1)         # (S, d_k)
    sin = jnp.concatenate([jnp.sin(ang), jnp.sin(ang)], axis=-1)
    sign = jnp.concatenate([-jnp.ones((S, half), jnp.float32),
                            jnp.ones((S, half), jnp.float32)], axis=-1)
    sins = sin * sign            # sign-folded: rotate_half(x)*sin == roll(x)*sins
    cos_q = cos * scale          # fold 1/sqrt(d_k) into the q-side tables (free)
    sins_q = sins * scale

    Tq = _tile(S, q_block or _Q_BLOCK, 8)
    nq = S // Tq

    kernel = functools.partial(_rope_gqa_attn_kernel, group=group,
                               return_weights=return_weights)

    out_shape = [jax.ShapeDtypeStruct((B, num_heads, S, d_k), jnp.bfloat16)]
    out_specs = [pl.BlockSpec((1, group, Tq, d_k), lambda b, g, qi: (b, g, qi, 0))]
    if return_weights:
        out_shape.append(jax.ShapeDtypeStruct((B, num_heads, S, S), jnp.float32))
        out_specs.append(pl.BlockSpec((1, group, Tq, S), lambda b, g, qi: (b, g, qi, 0)))
    # TODO(synk): for very long S (esp. on v7x's 64 MiB VMEM) the weights block
    # and the full-S K/V residency should move to a flash-style online softmax
    # over an S-tiled axis; not needed at these sizes.

    flops = 4 * B * num_heads * S * S * d_k
    bytes_accessed = ((Q.size + K.size + V.size) * 2 + B * num_heads * S * d_k * 2
                      + (B * num_heads * S * S * 4 if return_weights else 0)
                      + (cos_q.size + sins_q.size + cos.size + sins.size) * 4)

    res = pl.pallas_call(
        kernel,
        out_shape=tuple(out_shape),
        grid=(B, num_kv_heads, nq),
        in_specs=[
            # all query heads sharing KV head g (heads g*group .. (g+1)*group-1)
            pl.BlockSpec((1, group, Tq, d_k), lambda b, g, qi: (b, g, qi, 0)),
            # K / V fetched once per (b, g); revisits across qi skip the DMA
            pl.BlockSpec((1, 1, S, d_k), lambda b, g, qi: (b, g, 0, 0)),
            pl.BlockSpec((1, 1, S, d_k), lambda b, g, qi: (b, g, 0, 0)),
            pl.BlockSpec((Tq, d_k), lambda b, g, qi: (qi, 0)),   # cos_q (scaled)
            pl.BlockSpec((Tq, d_k), lambda b, g, qi: (qi, 0)),   # sin_q (scaled)
            pl.BlockSpec((S, d_k), lambda b, g, qi: (0, 0)),     # cos_k
            pl.BlockSpec((S, d_k), lambda b, g, qi: (0, 0)),     # sin_k
        ],
        out_specs=tuple(out_specs),
        scratch_shapes=[pltpu.VMEM((S, d_k), jnp.bfloat16)],     # cached rotated K
        compiler_params=pltpu.CompilerParams(
            # qi kept "arbitrary" so each core runs all query blocks of a fixed
            # (b, g) consecutively: K/V blocks stay resident and the k_rot
            # scratch computed at qi == 0 stays valid.
            dimension_semantics=("parallel", "parallel", "arbitrary"),
            vmem_limit_bytes=_VMEM_LIMIT),
        cost_estimate=pl.CostEstimate(flops=flops,
                                      transcendentals=B * num_heads * S * S,
                                      bytes_accessed=int(bytes_accessed)),
    )(Q, K, V, cos_q, sins_q, cos, sins)

    attn_out = res[0]
    attn_w = res[1] if return_weights else None

    merged = attn_out.transpose(0, 2, 1, 3).reshape(B * S, d_model)   # bf16
    out = pallas_linear(merged, params["wo"], params["bo"],
                        out_dtype=jnp.float32).reshape(B, S, d_model)
    return out, attn_w


# ---------------------------------------------------------------------------
# Pure-JAX reference (same math, f32) for correctness checking
# ---------------------------------------------------------------------------
def _reference(params, query, key, value, *, num_heads, num_kv_heads, rope_base=10000.0):
    B, S, d_model = query.shape
    d_k = d_model // num_heads
    group = num_heads // num_kv_heads

    def lin(x, w, b):
        return x @ w.T + b

    Q = lin(query, params["wq"], params["bq"]).reshape(B, S, num_heads, d_k).transpose(0, 2, 1, 3)
    K = lin(key, params["wk"], params["bk"]).reshape(B, S, num_kv_heads, d_k).transpose(0, 2, 1, 3)
    V = lin(value, params["wv"], params["bv"]).reshape(B, S, num_kv_heads, d_k).transpose(0, 2, 1, 3)
    K = jnp.repeat(K, group, axis=1)
    V = jnp.repeat(V, group, axis=1)

    pos = jnp.arange(S, dtype=jnp.float32)
    inv_freq = 1.0 / (rope_base ** (jnp.arange(0, d_k, 2, dtype=jnp.float32) / d_k))
    ang = pos[:, None] * inv_freq[None, :]
    cos = jnp.concatenate([jnp.cos(ang), jnp.cos(ang)], -1)
    sin = jnp.concatenate([jnp.sin(ang), jnp.sin(ang)], -1)

    def rot_half(x):
        return jnp.concatenate([-x[..., d_k // 2:], x[..., : d_k // 2]], -1)

    Qr = Q * cos + rot_half(Q) * sin
    Kr = K * cos + rot_half(K) * sin

    scores = jnp.einsum("bhqd,bhkd->bhqk", Qr, Kr) / math.sqrt(d_k)
    w = jax.nn.softmax(scores, axis=-1)
    o = jnp.einsum("bhqk,bhkd->bhqd", w, V)
    o = o.transpose(0, 2, 1, 3).reshape(B, S, d_model)
    return o @ params["wo"].T + params["bo"], w


# ---------------------------------------------------------------------------
if __name__ == "__main__":
    B, S = 2, 8
    d_model, num_heads, num_kv_heads = 32, 4, 2
    d_k = d_model // num_heads

    rng = jax.random.PRNGKey(0)
    ks = jax.random.split(rng, 12)

    def linear_init(kw, kb, out_f, in_f):
        bound = 1.0 / math.sqrt(in_f)
        w = jax.random.uniform(kw, (out_f, in_f), jnp.float32, -bound, bound)
        b = jax.random.uniform(kb, (out_f,), jnp.float32, -bound, bound)
        return w, b

    wq, bq = linear_init(ks[0], ks[1], d_model, d_model)
    wk, bk = linear_init(ks[2], ks[3], d_k * num_kv_heads, d_model)
    wv, bv = linear_init(ks[4], ks[5], d_k * num_kv_heads, d_model)
    wo, bo = linear_init(ks[6], ks[7], d_model, d_model)
    params = dict(wq=wq, bq=bq, wk=wk, bk=bk, wv=wv, bv=bv, wo=wo, bo=bo)

    query = jax.random.normal(ks[8], (B, S, d_model), jnp.float32)
    key_in = jax.random.normal(ks[9], (B, S, d_model), jnp.float32)
    value = jax.random.normal(ks[10], (B, S, d_model), jnp.float32)

    # module-semantics path: returns the (B, H, S, S) attention weights
    out, attn_w = rope_gqa_forward(
        params, query, key_in, value,
        num_heads=num_heads, num_kv_heads=num_kv_heads)
    out = jax.block_until_ready(out)
    attn_w = jax.block_until_ready(attn_w)

    # fast path: no weights writeback, normalization after the PV matmul
    out_fast, w_none = rope_gqa_forward(
        params, query, key_in, value,
        num_heads=num_heads, num_kv_heads=num_kv_heads, return_weights=False)
    out_fast = jax.block_until_ready(out_fast)

    ref_out, ref_w = _reference(
        params, query, key_in, value,
        num_heads=num_heads, num_kv_heads=num_kv_heads)

    assert out.shape == (B, S, d_model)
    assert attn_w.shape == (B, num_heads, S, S)
    assert w_none is None
    # tolerances account for bf16 MXU operands (f32 accumulation) and the EUP
    # approximate reciprocal in the softmax denominator.
    assert jnp.allclose(out, ref_out, atol=5e-2, rtol=5e-2)
    assert jnp.allclose(out_fast, ref_out, atol=5e-2, rtol=5e-2)
    assert jnp.allclose(attn_w, ref_w, atol=3e-2, rtol=3e-2)

    print("KERNEL_OK")
</pallas_src>

<mosaic_0001>
module attributes {stable_mosaic.version = 11 : i64} {
  func.func @_linear_kernel(%arg0: i32, %arg1: i32, %arg2: i32, %arg3: memref<16x32xf32, #tpu.memory_space<vmem>>, %arg4: memref<32x32xbf16, #tpu.memory_space<vmem>>, %arg5: memref<1x32xf32, #tpu.memory_space<vmem>>, %arg6: memref<16x32xbf16, #tpu.memory_space<vmem>>, %arg7: memref<16x32xf32, #tpu.memory_space<vmem>>) attributes {dimension_semantics = [#tpu.dimension_semantics<parallel>, #tpu.dimension_semantics<parallel>, #tpu.dimension_semantics<arbitrary>], iteration_bounds = array<i64: 1, 1, 1>, scalar_prefetch = 0 : i64, scratch_operands = 1 : i64, tpu.core_type = #tpu.core_type<tc>, window_params = [{transform_indices = @transform_0, window_bounds = array<i64: 16, 32>}, {transform_indices = @transform_1, window_bounds = array<i64: 32, 32>}, {transform_indices = @transform_2, window_bounds = array<i64: 1, 32>}, {transform_indices = @transform_3, window_bounds = array<i64: 16, 32>}]} {
    %c0_i32 = arith.constant 0 : i32
    %0 = arith.cmpi eq, %arg2, %c0_i32 : i32
    %1 = arith.extui %0 : i1 to i32
    %c0_i32_0 = arith.constant 0 : i32
    %2 = arith.cmpi ne, %1, %c0_i32_0 : i32
    scf.if %2 {
      %cst_10 = arith.constant 0.000000e+00 : f32
      %13 = vector.broadcast %cst_10 : f32 to vector<16x32xf32>
      %c0_11 = arith.constant 0 : index
      %c0_12 = arith.constant 0 : index
      %14 = vector.load %arg7[%c0_11, %c0_12] : memref<16x32xf32, #tpu.memory_space<vmem>>, vector<16x32xf32>
      tpu.vector_store %arg7[%c0_11, %c0_12], %13 {strides = array<i32>} : memref<16x32xf32, #tpu.memory_space<vmem>>, vector<16x32xf32>,
    } else {
    }
    %c0 = arith.constant 0 : index
    %c0_1 = arith.constant 0 : index
    %3 = vector.load %arg7[%c0, %c0_1] : memref<16x32xf32, #tpu.memory_space<vmem>>, vector<16x32xf32>
    %c0_2 = arith.constant 0 : index
    %c0_3 = arith.constant 0 : index
    %4 = vector.load %arg3[%c0_2, %c0_3] : memref<16x32xf32, #tpu.memory_space<vmem>>, vector<16x32xf32>
    %5 = arith.truncf %4 : vector<16x32xf32> to vector<16x32xbf16>
    %c0_4 = arith.constant 0 : index
    %c0_5 = arith.constant 0 : index
    %6 = vector.load %arg4[%c0_4, %c0_5] : memref<32x32xbf16, #tpu.memory_space<vmem>>, vector<32x32xbf16>
    %cst = arith.constant dense<0.000000e+00> : vector<16x32xf32>
    %7 = tpu.matmul %5, %6, %cst {dimension_numbers = #tpu.dot_dimension_numbers<[1], [1], [0], [0], [0, 0, 1, 0], [], []>} : vector<16x32xbf16>, vector<32x32xbf16>, vector<16x32xf32> -> vector<16x32xf32>
    %8 = arith.addf %3, %7 : vector<16x32xf32>
    %c0_6 = arith.constant 0 : index
    %c0_7 = arith.constant 0 : index
    %9 = vector.load %arg7[%c0_6, %c0_7] : memref<16x32xf32, #tpu.memory_space<vmem>>, vector<16x32xf32>
    tpu.vector_store %arg7[%c0_6, %c0_7], %8 {strides = array<i32>} : memref<16x32xf32, #tpu.memory_space<vmem>>, vector<16x32xf32>,
    %c0_i32_8 = arith.constant 0 : i32
    %10 = arith.cmpi eq, %arg2, %c0_i32_8 : i32
    %11 = arith.extui %10 : i1 to i32
    %c0_i32_9 = arith.constant 0 : i32
    %12 = arith.cmpi ne, %11, %c0_i32_9 : i32
    scf.if %12 {
      %c0_10 = arith.constant 0 : index
      %c0_11 = arith.constant 0 : index
      %13 = vector.load %arg7[%c0_10, %c0_11] : memref<16x32xf32, #tpu.memory_space<vmem>>, vector<16x32xf32>
      %c0_12 = arith.constant 0 : index
      %c0_13 = arith.constant 0 : index
      %14 = vector.load %arg5[%c0_12, %c0_13] : memref<1x32xf32, #tpu.memory_space<vmem>>, vector<1x32xf32>
      %15 = vector.broadcast %14 : vector<1x32xf32> to vector<16x32xf32>
      %16 = arith.addf %13, %15 : vector<16x32xf32>
      %17 = arith.truncf %16 : vector<16x32xf32> to vector<16x32xbf16>
      %c0_14 = arith.constant 0 : index
      %c0_15 = arith.constant 0 : index
      %18 = vector.load %arg6[%c0_14, %c0_15] : memref<16x32xbf16, #tpu.memory_space<vmem>>, vector<16x32xbf16>
      tpu.vector_store %arg6[%c0_14, %c0_15], %17 {strides = array<i32>} : memref<16x32xbf16, #tpu.memory_space<vmem>>, vector<16x32xbf16>,
    } else {
    }
    return
  }
  func.func @transform_0(%arg0: i32, %arg1: i32, %arg2: i32) -> (i32, i32) {
    %c0_i32 = arith.constant 0 : i32
    return %arg0, %arg2 : i32, i32
  }
  func.func @transform_1(%arg0: i32, %arg1: i32, %arg2: i32) -> (i32, i32) {
    %c0_i32 = arith.constant 0 : i32
    return %arg1, %arg2 : i32, i32
  }
  func.func @transform_2(%arg0: i32, %arg1: i32, %arg2: i32) -> (i32, i32) {
    %c0_i32 = arith.constant 0 : i32
    %c0_i32_0 = arith.constant 0 : i32
    return %c0_i32, %arg1 : i32, i32
  }
  func.func @transform_3(%arg0: i32, %arg1: i32, %arg2: i32) -> (i32, i32) {
    %c0_i32 = arith.constant 0 : i32
    return %arg0, %arg1 : i32, i32
  }
}

</mosaic_0001>

<bundles_post_ra>
// kernel: tpu_custom_call.1
= control target key start
LH: loop header
LB: loop body
LE: loop exit
PB: predicated region body
PF: predicated region fallthrough
CT: control target
= control target key end

     0   :  { %8 = vsyncpa [#allocation4], 0  ;;  %s318_s0 = inlined_call_operand.hbm [shape: f32[16,32], index: 0, kind: input, shape index: {}]   ;;  %s319_s1 = inlined_call_operand.hbm [shape: bf16[32,32], index: 1, kind: input, shape index: {}]   ;;  %s320_s2 = inlined_call_operand.vmem [shape: f32[1,32], index: 2, kind: input, shape index: {}]   ;;  %s321_s3 = inlined_call_operand.hbm [shape: bf16[16,32], index: 3, kind: output, shape index: {}]  }
   0x1   :  { %9 = vsyncpa [#allocation7], 0 }
   0x2   :  { %10 = vsyncpa [#allocation5], 0  ;;  %s264_s12 = smov [#allocation3]  }
   0x3   :  { %s16_s13 = sshll.u32 %s264_s12, 4  ;;  %s17_s13 = int_to_ptr.vmem [resolvable:$true] %s16_s13 }
   0x4   :  { %s206_s14 = scalar_lea.vmem %s17_s13, 256  ;;  %p211_p1 = scmp.lt.s32.totalorder %s17_s13, %s17_s13 }
   0x5   :  { %p207_p0 = scmp.ne.s32.totalorder %s17_s13, %s206_s14  ;;  %p212_p2 = scmp.lt.s32.totalorder %s206_s14, %s206_s14 }
   0x7   :  { %p213_p3 = por %p212_p2, %p211_p1 }
   0x9   :  { %p214_p4 = pnand %p213_p3, %p207_p0 }
   0xb   :  { %217 = shalt.err (!%p214_p4)
}
   0xc   :  { %s265_s15 = smov 128   ;;  %s266_s16 = smov 8  }
   0xd   :  { %22 = dma.hbm_to_vmem [thread:$0]  %s318_s0, 256, %s17_s13, [#allocation4], %s265_s15, %s265_s15, %s266_s16  }
   0xe   :  { %s267_s19 = smov [#allocation6]  }
   0xf   :  { %s28_s20 = sshll.u32 %s267_s19, 4  ;;  %s29_s20 = int_to_ptr.vmem [resolvable:$true] %s28_s20 }
  0x10   :  { %s226_s21 = scalar_lea.vmem %s29_s20, 256  ;;  %p231_p6 = scmp.lt.s32.totalorder %s29_s20, %s29_s20 }
  0x11   :  { %p227_p5 = scmp.ne.s32.totalorder %s29_s20, %s226_s21  ;;  %p232_p7 = scmp.lt.s32.totalorder %s226_s21, %s226_s21 }
  0x13   :  { %p233_p8 = por %p232_p7, %p231_p6 }
  0x15   :  { %p234_p9 = pnand %p233_p8, %p227_p5 }
  0x17   :  { %237 = shalt.err (!%p234_p9)
}
  0x18   :  { %s268_s22 = smov 64   ;;  %s269_s23 = smov 4  }
  0x19   :  { %34 = dma.hbm_to_vmem [thread:$0]  %s319_s1, 256, %s29_s20, [#allocation7], %s268_s22, %s268_s22, %s269_s23  }
  0x1a   :  { %258 = dma.done.wait [#allocation4], 256  }
  0x1b   :  { %259 = vsyncadd [#allocation4], 4294967040 }
  0x1c   :  { %260 = dma.done.wait [#allocation7], 256  }
  0x1d   :  { %261 = vsyncadd [#allocation7], 4294967040  ;;  %vm48_vm0 = vcmask 261120   ;;  %v270_v0 = vmov 0.0   ;;  %vm271_vm1 = vmmov 0   ;;  %v196_v1 = vld [vmem:[#allocation6 + $0x8] sm:$0xff]  }
  0x1e   :  { %49 = vst.msk [vmem:[#allocation2] sm:$0xff] %vm48_vm0, %v270_v0  ;;  %50 = vst.msk [vmem:[#allocation2 + $0x8] sm:$0xff] %vm48_vm0, %v270_v0  ;;  %179 = vmatprep.subr.bf16.mxu0 %v270_v0  ;;  %183 = vmatprep.mubr.msk.bf16.mxu0 %vm271_vm1, %v270_v0  ;;  %v78_v2 = vsel %vm48_vm0, %v196_v1, 0  ;;  %v197_v3 = vld [vmem:[#allocation6] sm:$0xff]   ;;  %v53_v5 = vld [vmem:[#allocation3] sm:$0xff]  ;;  %vm147_vm2 = vcmask 257024  }
  0x1f   :  { %180 = vmatpush3.bf16.xpose.msra.mxu0 %v78_v2  ;;  %v75_v4 = vsel %vm48_vm0, %v197_v3, 0  ;;  %v54_v6 = vld [vmem:[#allocation3 + $0x8] sm:$0xff]  ;;  %v171_v16 = vld [vmem:[%s320_s2] ss:$0 sm:$0xff]  ;;  %s272_s26 = smov [#allocation8]  }
  0x20   :  { %181 = vmatprep.subr.bf16.mxu0 %v270_v0  ;;  %v55_v7 = vpack.c.bf16 %v54_v6, %v53_v5  ;;  %s155_s27 = sshll.u32 %s272_s26, 4  ;;  %s156_s27 = int_to_ptr.vmem [resolvable:$true] %s155_s27 }
  0x21   :  { %s238_s28 = scalar_lea.vmem %s156_s27, 128  ;;  %p243_p11 = scmp.lt.s32.totalorder %s156_s27, %s156_s27 }
  0x22   :  { %p239_p10 = scmp.ne.s32.totalorder %s156_s27, %s238_s28  ;;  %p244_p12 = scmp.lt.s32.totalorder %s238_s28, %s238_s28 }
  0x24   :  { %p245_p13 = por %p244_p12, %p243_p11 }
  0x25   :  { %v51_v8 = vld [vmem:[#allocation2] sm:$0xff]  ;;  %v52_v12 = vld [vmem:[#allocation2 + $0x8] sm:$0xff] }
  0x26   :  { %p246_p0 = pnand %p245_p13, %p239_p10 }
  0x27   :  { %182 = vmatpush3.bf16.xpose.msra.mxu0 %v75_v4 }
  0x2e   :  { %184 = vmatmul.mubr.msk.bf16.vlgmr.msra.gmra.mxu0 %vm48_vm0, %v55_v7 }
  0xee   :  { %v114_v9 = vpop.f32.mrf.mxu0 }
  0xef   :  { %v121_v10 = vadd.f32 %v114_v9, %v51_v8 }
  0xf0   :  { %v185_v11 = vpop.f32.mrf.mxu0 }
  0xf1   :  { %123 = vst.msk [vmem:[#allocation2] sm:$0xff] %vm48_vm0, %v121_v10 }
  0xf2   :  { %v117_v13 = vpop.f32.mrf.mxu0 }
  0xf3   :  { %v122_v14 = vadd.f32 %v117_v13, %v52_v12 }
  0xf4   :  { %v186_v15 = vpop.f32.mrf.mxu0 }
  0xf5   :  { %124 = vst.msk [vmem:[#allocation2 + $0x8] sm:$0xff] %vm48_vm0, %v122_v14 }
  0xf8   :  { %v128_v17 = vld [vmem:[#allocation2] sm:$0xff] }
  0xf9   :  { %v137_v18 = vadd.f32 %v171_v16, %v128_v17 }
  0xfb   :  { %v174_v19 = vpack.c.bf16 %v137_v18, %v137_v18 }
  0xfc   :  { %v129_v20 = vld [vmem:[#allocation2 + $0x8] sm:$0xff] }
  0xfd   :  { %v138_v21 = vadd.f32 %v171_v16, %v129_v20  ;;  %148 = vst.msk [vmem:[#allocation8] sm:$0xf] %vm147_vm2, %v174_v19 }
  0xff   :  { %v175_v22 = vpack.c.bf16 %v138_v21, %v138_v21 }
 0x101   :  { %149 = vst.msk [vmem:[#allocation8 + $0x4] sm:$0xf] %vm147_vm2, %v175_v22 }
 0x102   :  { %249 = shalt.err (!%p246_p0)
}
 0x103   :  { %161 = dma.vmem_to_hbm [thread:$0]  %s156_s27, 128, %s321_s3, [#allocation5], %s268_s22, %s268_s22, %s269_s23  }
 0x104   :  { %262 = dma.done.wait [#allocation5], 128  }
 0x105   :  { %263 = vsyncadd [#allocation5], 4294967168 }
 0x106   :  { %165 = vsyncpa [#allocation4], 1 }
 0x107   :  { %166 = vsyncpa [#allocation7], 1 }
 0x108   :  { %167 = vsyncpa [#allocation5], 1 }

</bundles_post_ra>
